<compile_context>
chip_gen: v7x
topology: tpu7x:2x2x1
jax: 0.10.0
libtpu: 0.0.40
codegen_flags: <defaults>
</compile_context>

<pallas_src>
import functools

import jax
import jax.numpy as jnp
from jax import lax
from jax.experimental import pallas as pl
from jax.experimental.pallas import tpu as pltpu


def _round_up(n, m):
    return ((n + m - 1) // m) * m


# ----------------------------------------------------------------------------
# Fused kernel: fc5 -> LSTM (time loop in-kernel) -> fc4
# ----------------------------------------------------------------------------
def _decode_kernel(x_ref, z_ref, p_ref, o_ref, xw_sc, ht_sc, *,
                   T, B, X, Z, H, GW, offs):
    (o_f5w, o_f5b, o_wih, o_whh, o_lb, o_f4w, o_f4b) = offs

    # ---- Packed parameter slab: static, 8-aligned row views -----------------
    fc5_w = p_ref[pl.ds(o_f5w, Z), :]        # (Z, GW)  cols >= H are zero
    fc5_b = p_ref[pl.ds(o_f5b, 1), :]        # (1, GW)
    w_ih = p_ref[pl.ds(o_wih, X), :]         # (X, GW)  cols >= 4H are zero
    w_hh = p_ref[pl.ds(o_whh, H), :]         # (H, GW)
    lstm_b = p_ref[pl.ds(o_lb, 1), :]        # (1, GW)

    # ---- fc5: h0 = z @ W5 + b5 ; c0 = 0 -------------------------------------
    h0 = (jnp.dot(z_ref[...], fc5_w, preferred_element_type=jnp.float32)
          + fc5_b)[:, :H]                    # (B, H)
    c0 = jnp.zeros((B, H), jnp.float32)

    # ---- input projection for ALL timesteps in one MXU matmul ---------------
    # (T*B, X) @ (X, GW) + (b_ih + b_hh)  ->  (T*B, GW), cols >= 4H stay zero.
    xw = (jnp.dot(x_ref[...], w_ih, preferred_element_type=jnp.float32)
          + lstm_b)
    xw_sc[...] = xw.reshape(T, B, GW)

    # ---- loop-invariant gate-select mask (hoisted out of the recurrence) ----
    # PyTorch gate order along lanes: [ i | f | g | o ]; only g uses tanh.
    lane = lax.broadcasted_iota(jnp.int32, (B, GW), 1)
    g_mask = (lane >= 2 * H) & (lane < 3 * H)

    def step(t, carry):
        h, c = carry
        gates = xw_sc[t] + jnp.dot(h, w_hh,
                                   preferred_element_type=jnp.float32)  # (B, GW)
        # Full-vreg activations (EUP slot) + lane-mask gate select.
        sig = jax.nn.sigmoid(gates)
        tnh = jnp.tanh(gates)
        act = jnp.where(g_mask, tnh, sig)

        i_g = act[:, 0 * H:1 * H]
        f_g = act[:, 1 * H:2 * H]
        g_g = act[:, 2 * H:3 * H]
        o_g = act[:, 3 * H:4 * H]

        c_new = f_g * c + i_g * g_g
        h_new = o_g * jnp.tanh(c_new)

        ht_sc[t] = h_new
        return h_new, c_new

    # T=8 -> full unroll is fine; switch to a bounded unroll (e.g. 4) if T
    # grows beyond ~16-32 to cap code size / vreg live ranges.
    lax.fori_loop(0, T, step, (h0, c0), unroll=True)

    # ---- dropout (eval mode: identity) + fc4 over all T*B rows at once ------
    fc4_w = p_ref[pl.ds(o_f4w, H), :]        # (H, GW)  cols >= V are zero
    fc4_b = p_ref[pl.ds(o_f4b, 1), :]        # (1, GW)
    ht = ht_sc[...].reshape(T * B, H)
    # (T*B, GW) lane-dense, unmasked full-lane store.
    o_ref[...] = (jnp.dot(ht, fc4_w, preferred_element_type=jnp.float32)
                  + fc4_b)


# ----------------------------------------------------------------------------
# Wrapper
# ----------------------------------------------------------------------------
def decode_forward(x_emb, z, params, *, hidden_dim, vocab_size, gw, offs):
    # x_emb: (T, B, X), z: (B, Z), params: packed (rows, GW) slab -> (T, B, V)
    T, B, X = x_emb.shape
    Z = z.shape[1]
    H, V, GW = hidden_dim, vocab_size, gw

    # Pad batch to a multiple of 8 so per-step tiles are (8, 128)-aligned.
    Bp = _round_up(B, 8)
    if Bp != B:
        x_emb = jnp.pad(x_emb, ((0, 0), (0, Bp - B), (0, 0)))
        z = jnp.pad(z, ((0, Bp - B), (0, 0)))
    x2d = x_emb.reshape(T * Bp, X)           # contiguous reshape: free in XLA

    kernel = functools.partial(_decode_kernel, T=T, B=Bp, X=X, Z=Z, H=H,
                               GW=GW, offs=offs)

    # Advisory cost estimate so XLA can overlap this tiny custom call.
    flops = int(2 * Bp * Z * GW            # fc5
                + 2 * T * Bp * X * GW      # input projection
                + 2 * T * Bp * H * GW      # recurrent matmuls
                + 8 * T * Bp * GW          # gate elementwise (approx)
                + 2 * T * Bp * H * GW)     # fc4
    transcendentals = int(T * (2 * Bp * GW + Bp * H))
    bytes_accessed = int(4 * (x2d.size + z.size + params.size + T * Bp * GW))

    vmem = lambda: pl.BlockSpec(memory_space=pltpu.MemorySpace.VMEM)
    recon = pl.pallas_call(
        kernel,
        out_shape=jax.ShapeDtypeStruct((T * Bp, GW), jnp.float32),
        in_specs=[vmem(), vmem(), vmem()],     # x2d, z, packed params
        out_specs=vmem(),
        scratch_shapes=[
            pltpu.VMEM((T, Bp, GW), jnp.float32),   # x @ W_ih + b, all steps
            pltpu.VMEM((T, Bp, H), jnp.float32),    # ht accumulator
        ],
        cost_estimate=pl.CostEstimate(
            flops=flops, transcendentals=transcendentals,
            bytes_accessed=bytes_accessed),
    )(x2d, z, params)

    # Drop batch padding rows and vocab padding lanes.
    return recon.reshape(T, Bp, GW)[:, :B, :V]


# ----------------------------------------------------------------------------
# Parameter packing: one lane-dense slab, one DMA.
# ----------------------------------------------------------------------------
def _pack_params(mats, gw):
    """Stack 2-D params row-wise into one (rows, gw) slab. Each section's rows
    are padded to a multiple of 8 (so kernel row views are sublane-aligned)
    and its columns are zero-padded to gw (lane-dense)."""
    offs, blocks, off = [], [], 0
    for m in mats:
        r, c = m.shape
        rp = _round_up(r, 8)
        blk = jnp.zeros((rp, gw), jnp.float32).at[:r, :c].set(
            m.astype(jnp.float32))
        offs.append(off)
        blocks.append(blk)
        off += rp
    return jnp.concatenate(blocks, axis=0), tuple(offs)


# ----------------------------------------------------------------------------
# Decode module (parameter container + forward)
# ----------------------------------------------------------------------------
class Decode:
    def __init__(self, x_dim, z_dim, hidden_dim, vocab_size, bsz, key):
        self.x_dim = x_dim
        self.z_dim = z_dim
        self.hidden_dim = hidden_dim
        self.vocab_size = vocab_size
        self.bsz = bsz

        k = jax.random.split(key, 6)
        initrange = 0.1
        # fc5: Linear(z_dim, hidden_dim)  (stored transposed: (in, out))
        fc5_w = jax.random.uniform(
            k[0], (z_dim, hidden_dim), jnp.float32, -initrange, initrange)
        fc5_b = jnp.zeros((1, hidden_dim), jnp.float32)
        # fc4: Linear(hidden_dim, vocab_size)
        fc4_w = jax.random.uniform(
            k[1], (hidden_dim, vocab_size), jnp.float32, -initrange, initrange)
        fc4_b = jnp.zeros((1, vocab_size), jnp.float32)
        # LSTM(x_dim, hidden_dim): PyTorch default init U(-1/sqrt(H), 1/sqrt(H)),
        # gate order [i, f, g, o]; stored transposed so the kernel does x @ W.
        bound = 1.0 / (hidden_dim ** 0.5)
        w_ih = jax.random.uniform(
            k[2], (x_dim, 4 * hidden_dim), jnp.float32, -bound, bound)
        w_hh = jax.random.uniform(
            k[3], (hidden_dim, 4 * hidden_dim), jnp.float32, -bound, bound)
        b_ih = jax.random.uniform(
            k[4], (4 * hidden_dim,), jnp.float32, -bound, bound)
        b_hh = jax.random.uniform(
            k[5], (4 * hidden_dim,), jnp.float32, -bound, bound)
        lstm_b = (b_ih + b_hh).reshape(1, 4 * hidden_dim)

        # Keep raw params (for reference check) and build the packed slab once.
        self.raw = dict(fc5_w=fc5_w, fc5_b=fc5_b, w_ih=w_ih, w_hh=w_hh,
                        lstm_b=lstm_b, fc4_w=fc4_w, fc4_b=fc4_b)
        self._gw = _round_up(max(4 * hidden_dim, vocab_size), 128)
        self.params, self._offs = _pack_params(
            [fc5_w, fc5_b, w_ih, w_hh, lstm_b, fc4_w, fc4_b], self._gw)

        self._forward = jax.jit(functools.partial(
            decode_forward, hidden_dim=hidden_dim, vocab_size=vocab_size,
            gw=self._gw, offs=self._offs))

    def __call__(self, x_emb, z):
        return self._forward(x_emb, z, self.params)


# ----------------------------------------------------------------------------
# Pure-JAX reference (for a correctness sanity check)
# ----------------------------------------------------------------------------
def _reference(x_emb, z, p):
    T = x_emb.shape[0]
    h = z @ p["fc5_w"] + p["fc5_b"]
    c = jnp.zeros_like(h)
    outs = []
    for t in range(T):
        gates = x_emb[t] @ p["w_ih"] + p["lstm_b"] + h @ p["w_hh"]
        i, f, g, o = jnp.split(gates, 4, axis=-1)
        i, f, o = jax.nn.sigmoid(i), jax.nn.sigmoid(f), jax.nn.sigmoid(o)
        g = jnp.tanh(g)
        c = f * c + i * g
        h = o * jnp.tanh(c)
        outs.append(h @ p["fc4_w"] + p["fc4_b"])
    return jnp.stack(outs, axis=0)


if __name__ == "__main__":
    # Small shapes consistent with the module's forward.
    seq_len, bsz = 8, 4
    x_dim, z_dim, hidden_dim, vocab_size = 16, 8, 32, 64

    key = jax.random.PRNGKey(0)
    k_params, k_x, k_z = jax.random.split(key, 3)

    model = Decode(x_dim, z_dim, hidden_dim, vocab_size, bsz, k_params)

    x_emb = jax.random.normal(k_x, (seq_len, bsz, x_dim), jnp.float32)
    z = jax.random.normal(k_z, (bsz, z_dim), jnp.float32)

    recon = model(x_emb, z)
    jax.block_until_ready(recon)
    assert recon.shape == (seq_len, bsz, vocab_size)

    ref = _reference(x_emb, z, model.raw)
    err = float(jnp.max(jnp.abs(recon - ref)))
    assert err < 1e-3, f"max abs error vs reference: {err}"

    print("KERNEL_OK")
</pallas_src>

<mosaic_0001>
module attributes {stable_mosaic.version = 11 : i64} {
  func.func @_decode_kernel(%arg0: memref<64x16xf32, #tpu.memory_space<vmem>>, %arg1: memref<8x8xf32, #tpu.memory_space<vmem>>, %arg2: memref<112x128xf32, #tpu.memory_space<vmem>>, %arg3: memref<64x128xf32, #tpu.memory_space<vmem>>, %arg4: memref<8x8x128xf32, #tpu.memory_space<vmem>>, %arg5: memref<8x8x32xf32, #tpu.memory_space<vmem>>) attributes {dimension_semantics = [], scalar_prefetch = 0 : i64, scratch_operands = 2 : i64, tpu.core_type = #tpu.core_type<tc>} {
    %c0 = arith.constant 0 : index
    %c0_0 = arith.constant 0 : index
    %0 = vector.load %arg2[%c0, %c0_0] : memref<112x128xf32, #tpu.memory_space<vmem>>, vector<8x128xf32>
    %c8 = arith.constant 8 : index
    %c0_1 = arith.constant 0 : index
    %1 = vector.load %arg2[%c8, %c0_1] : memref<112x128xf32, #tpu.memory_space<vmem>>, vector<1x128xf32>
    %c16 = arith.constant 16 : index
    %c0_2 = arith.constant 0 : index
    %2 = vector.load %arg2[%c16, %c0_2] : memref<112x128xf32, #tpu.memory_space<vmem>>, vector<16x128xf32>
    %c32 = arith.constant 32 : index
    %c0_3 = arith.constant 0 : index
    %3 = vector.load %arg2[%c32, %c0_3] : memref<112x128xf32, #tpu.memory_space<vmem>>, vector<32x128xf32>
    %c64 = arith.constant 64 : index
    %c0_4 = arith.constant 0 : index
    %4 = vector.load %arg2[%c64, %c0_4] : memref<112x128xf32, #tpu.memory_space<vmem>>, vector<1x128xf32>
    %c0_5 = arith.constant 0 : index
    %c0_6 = arith.constant 0 : index
    %5 = vector.load %arg1[%c0_5, %c0_6] : memref<8x8xf32, #tpu.memory_space<vmem>>, vector<8x8xf32>
    %cst = arith.constant dense<0.000000e+00> : vector<8x128xf32>
    %6 = tpu.matmul %5, %0, %cst {dimension_numbers = #tpu.dot_dimension_numbers<[1], [0], [0], [1], [0, 0, 1, 1], [], []>} : vector<8x8xf32>, vector<8x128xf32>, vector<8x128xf32> -> vector<8x128xf32>
    %7 = vector.broadcast %1 : vector<1x128xf32> to vector<8x128xf32>
    %8 = arith.addf %6, %7 : vector<8x128xf32>
    %9 = vector.extract_strided_slice %8 {offsets = [0, 0], sizes = [8, 32], strides = [1, 1]} : vector<8x128xf32> to vector<8x32xf32>
    %cst_7 = arith.constant 0.000000e+00 : f32
    %10 = vector.broadcast %cst_7 : f32 to vector<8x32xf32>
    %c0_8 = arith.constant 0 : index
    %c0_9 = arith.constant 0 : index
    %11 = vector.load %arg0[%c0_8, %c0_9] : memref<64x16xf32, #tpu.memory_space<vmem>>, vector<64x16xf32>
    %cst_10 = arith.constant dense<0.000000e+00> : vector<64x128xf32>
    %12 = tpu.matmul %11, %2, %cst_10 {dimension_numbers = #tpu.dot_dimension_numbers<[1], [0], [0], [1], [0, 0, 1, 1], [], []>} : vector<64x16xf32>, vector<16x128xf32>, vector<64x128xf32> -> vector<64x128xf32>
    %13 = vector.broadcast %4 : vector<1x128xf32> to vector<64x128xf32>
    %14 = arith.addf %12, %13 : vector<64x128xf32>
    %15 = vector.shape_cast %14 : vector<64x128xf32> to vector<8x8x128xf32>
    %c0_11 = arith.constant 0 : index
    %c0_12 = arith.constant 0 : index
    %c0_13 = arith.constant 0 : index
    %16 = vector.load %arg4[%c0_11, %c0_12, %c0_13] : memref<8x8x128xf32, #tpu.memory_space<vmem>>, vector<8x8x128xf32>
    tpu.vector_store %arg4[%c0_11, %c0_12, %c0_13], %15 {strides = array<i32>} : memref<8x8x128xf32, #tpu.memory_space<vmem>>, vector<8x8x128xf32>,
    %17 = tpu.iota {dimensions = array<i32: 1>} : vector<8x128xi32>
    %c64_i32 = arith.constant 64 : i32
    %18 = vector.broadcast %c64_i32 : i32 to vector<8x128xi32>
    %19 = arith.cmpi sge, %17, %18 : vector<8x128xi32>
    %c96_i32 = arith.constant 96 : i32
    %20 = vector.broadcast %c96_i32 : i32 to vector<8x128xi32>
    %21 = arith.cmpi slt, %17, %20 : vector<8x128xi32>
    %22 = arith.andi %19, %21 : vector<8x128xi1>
    %c0_i32 = arith.constant 0 : i32
    %23 = arith.index_cast %c0_i32 : i32 to index
    %c0_14 = arith.constant 0 : index
    %c0_15 = arith.constant 0 : index
    %24 = vector.load %arg4[%23, %c0_14, %c0_15] : memref<8x8x128xf32, #tpu.memory_space<vmem>>, vector<1x8x128xf32>
    %25 = vector.shape_cast %24 : vector<1x8x128xf32> to vector<8x128xf32>
    %cst_16 = arith.constant dense<0.000000e+00> : vector<8x128xf32>
    %26 = tpu.matmul %9, %3, %cst_16 {dimension_numbers = #tpu.dot_dimension_numbers<[1], [0], [0], [1], [0, 0, 1, 1], [], []>} : vector<8x32xf32>, vector<32x128xf32>, vector<8x128xf32> -> vector<8x128xf32>
    %27 = arith.addf %25, %26 : vector<8x128xf32>
    %28 = arith.negf %27 : vector<8x128xf32>
    %29 = math.exp %28 : vector<8x128xf32>
    %cst_17 = arith.constant 1.000000e+00 : f32
    %30 = vector.broadcast %cst_17 : f32 to vector<8x128xf32>
    %31 = arith.addf %30, %29 : vector<8x128xf32>
    %32 = arith.divf %30, %31 : vector<8x128xf32>
    %33 = math.tanh %27 : vector<8x128xf32>
    %34 = arith.select %22, %33, %32 : vector<8x128xi1>, vector<8x128xf32>
    %35 = vector.extract_strided_slice %34 {offsets = [0, 0], sizes = [8, 32], strides = [1, 1]} : vector<8x128xf32> to vector<8x32xf32>
    %36 = vector.extract_strided_slice %34 {offsets = [0, 32], sizes = [8, 32], strides = [1, 1]} : vector<8x128xf32> to vector<8x32xf32>
    %37 = vector.extract_strided_slice %34 {offsets = [0, 64], sizes = [8, 32], strides = [1, 1]} : vector<8x128xf32> to vector<8x32xf32>
    %38 = vector.extract_strided_slice %34 {offsets = [0, 96], sizes = [8, 32], strides = [1, 1]} : vector<8x128xf32> to vector<8x32xf32>
    %39 = arith.mulf %36, %10 : vector<8x32xf32>
    %40 = arith.mulf %35, %37 : vector<8x32xf32>
    %41 = arith.addf %39, %40 : vector<8x32xf32>
    %42 = math.tanh %41 : vector<8x32xf32>
    %43 = arith.mulf %38, %42 : vector<8x32xf32>
    %44 = arith.index_cast %c0_i32 : i32 to index
    %c0_18 = arith.constant 0 : index
    %c0_19 = arith.constant 0 : index
    %45 = vector.load %arg5[%44, %c0_18, %c0_19] : memref<8x8x32xf32, #tpu.memory_space<vmem>>, vector<1x8x32xf32>
    %46 = vector.shape_cast %45 : vector<1x8x32xf32> to vector<8x32xf32>
    %47 = vector.shape_cast %43 : vector<8x32xf32> to vector<1x8x32xf32>
    tpu.vector_store %arg5[%44, %c0_18, %c0_19], %47 {strides = array<i32>} : memref<8x8x32xf32, #tpu.memory_space<vmem>>, vector<1x8x32xf32>,
    %c1_i32 = arith.constant 1 : i32
    %48 = arith.index_cast %c1_i32 : i32 to index
    %c0_20 = arith.constant 0 : index
    %c0_21 = arith.constant 0 : index
    %49 = vector.load %arg4[%48, %c0_20, %c0_21] : memref<8x8x128xf32, #tpu.memory_space<vmem>>, vector<1x8x128xf32>
    %50 = vector.shape_cast %49 : vector<1x8x128xf32> to vector<8x128xf32>
    %cst_22 = arith.constant dense<0.000000e+00> : vector<8x128xf32>
    %51 = tpu.matmul %43, %3, %cst_22 {dimension_numbers = #tpu.dot_dimension_numbers<[1], [0], [0], [1], [0, 0, 1, 1], [], []>} : vector<8x32xf32>, vector<32x128xf32>, vector<8x128xf32> -> vector<8x128xf32>
    %52 = arith.addf %50, %51 : vector<8x128xf32>
    %53 = arith.negf %52 : vector<8x128xf32>
    %54 = math.exp %53 : vector<8x128xf32>
    %cst_23 = arith.constant 1.000000e+00 : f32
    %55 = vector.broadcast %cst_23 : f32 to vector<8x128xf32>
    %56 = arith.addf %55, %54 : vector<8x128xf32>
    %57 = arith.divf %55, %56 : vector<8x128xf32>
    %58 = math.tanh %52 : vector<8x128xf32>
    %59 = arith.select %22, %58, %57 : vector<8x128xi1>, vector<8x128xf32>
    %60 = vector.extract_strided_slice %59 {offsets = [0, 0], sizes = [8, 32], strides = [1, 1]} : vector<8x128xf32> to vector<8x32xf32>
    %61 = vector.extract_strided_slice %59 {offsets = [0, 32], sizes = [8, 32], strides = [1, 1]} : vector<8x128xf32> to vector<8x32xf32>
    %62 = vector.extract_strided_slice %59 {offsets = [0, 64], sizes = [8, 32], strides = [1, 1]} : vector<8x128xf32> to vector<8x32xf32>
    %63 = vector.extract_strided_slice %59 {offsets = [0, 96], sizes = [8, 32], strides = [1, 1]} : vector<8x128xf32> to vector<8x32xf32>
    %64 = arith.mulf %61, %41 : vector<8x32xf32>
    %65 = arith.mulf %60, %62 : vector<8x32xf32>
    %66 = arith.addf %64, %65 : vector<8x32xf32>
    %67 = math.tanh %66 : vector<8x32xf32>
    %68 = arith.mulf %63, %67 : vector<8x32xf32>
    %69 = arith.index_cast %c1_i32 : i32 to index
    %c0_24 = arith.constant 0 : index
    %c0_25 = arith.constant 0 : index
    %70 = vector.load %arg5[%69, %c0_24, %c0_25] : memref<8x8x32xf32, #tpu.memory_space<vmem>>, vector<1x8x32xf32>
    %71 = vector.shape_cast %70 : vector<1x8x32xf32> to vector<8x32xf32>
    %72 = vector.shape_cast %68 : vector<8x32xf32> to vector<1x8x32xf32>
    tpu.vector_store %arg5[%69, %c0_24, %c0_25], %72 {strides = array<i32>} : memref<8x8x32xf32, #tpu.memory_space<vmem>>, vector<1x8x32xf32>,
    %c2_i32 = arith.constant 2 : i32
    %73 = arith.index_cast %c2_i32 : i32 to index
    %c0_26 = arith.constant 0 : index
    %c0_27 = arith.constant 0 : index
    %74 = vector.load %arg4[%73, %c0_26, %c0_27] : memref<8x8x128xf32, #tpu.memory_space<vmem>>, vector<1x8x128xf32>
    %75 = vector.shape_cast %74 : vector<1x8x128xf32> to vector<8x128xf32>
    %cst_28 = arith.constant dense<0.000000e+00> : vector<8x128xf32>
    %76 = tpu.matmul %68, %3, %cst_28 {dimension_numbers = #tpu.dot_dimension_numbers<[1], [0], [0], [1], [0, 0, 1, 1], [], []>} : vector<8x32xf32>, vector<32x128xf32>, vector<8x128xf32> -> vector<8x128xf32>
    %77 = arith.addf %75, %76 : vector<8x128xf32>
    %78 = arith.negf %77 : vector<8x128xf32>
    %79 = math.exp %78 : vector<8x128xf32>
    %cst_29 = arith.constant 1.000000e+00 : f32
    %80 = vector.broadcast %cst_29 : f32 to vector<8x128xf32>
    %81 = arith.addf %80, %79 : vector<8x128xf32>
    %82 = arith.divf %80, %81 : vector<8x128xf32>
    %83 = math.tanh %77 : vector<8x128xf32>
    %84 = arith.select %22, %83, %82 : vector<8x128xi1>, vector<8x128xf32>
    %85 = vector.extract_strided_slice %84 {offsets = [0, 0], sizes = [8, 32], strides = [1, 1]} : vector<8x128xf32> to vector<8x32xf32>
    %86 = vector.extract_strided_slice %84 {offsets = [0, 32], sizes = [8, 32], strides = [1, 1]} : vector<8x128xf32> to vector<8x32xf32>
    %87 = vector.extract_strided_slice %84 {offsets = [0, 64], sizes = [8, 32], strides = [1, 1]} : vector<8x128xf32> to vector<8x32xf32>
    %88 = vector.extract_strided_slice %84 {offsets = [0, 96], sizes = [8, 32], strides = [1, 1]} : vector<8x128xf32> to vector<8x32xf32>
    %89 = arith.mulf %86, %66 : vector<8x32xf32>
    %90 = arith.mulf %85, %87 : vector<8x32xf32>
    %91 = arith.addf %89, %90 : vector<8x32xf32>
    %92 = math.tanh %91 : vector<8x32xf32>
    %93 = arith.mulf %88, %92 : vector<8x32xf32>
    %94 = arith.index_cast %c2_i32 : i32 to index
    %c0_30 = arith.constant 0 : index
    %c0_31 = arith.constant 0 : index
    %95 = vector.load %arg5[%94, %c0_30, %c0_31] : memref<8x8x32xf32, #tpu.memory_space<vmem>>, vector<1x8x32xf32>
    %96 = vector.shape_cast %95 : vector<1x8x32xf32> to vector<8x32xf32>
    %97 = vector.shape_cast %93 : vector<8x32xf32> to vector<1x8x32xf32>
    tpu.vector_store %arg5[%94, %c0_30, %c0_31], %97 {strides = array<i32>} : memref<8x8x32xf32, #tpu.memory_space<vmem>>, vector<1x8x32xf32>,
    %c3_i32 = arith.constant 3 : i32
    %98 = arith.index_cast %c3_i32 : i32 to index
    %c0_32 = arith.constant 0 : index
    %c0_33 = arith.constant 0 : index
    %99 = vector.load %arg4[%98, %c0_32, %c0_33] : memref<8x8x128xf32, #tpu.memory_space<vmem>>, vector<1x8x128xf32>
    %100 = vector.shape_cast %99 : vector<1x8x128xf32> to vector<8x128xf32>
    %cst_34 = arith.constant dense<0.000000e+00> : vector<8x128xf32>
    %101 = tpu.matmul %93, %3, %cst_34 {dimension_numbers = #tpu.dot_dimension_numbers<[1], [0], [0], [1], [0, 0, 1, 1], [], []>} : vector<8x32xf32>, vector<32x128xf32>, vector<8x128xf32> -> vector<8x128xf32>
    %102 = arith.addf %100, %101 : vector<8x128xf32>
    %103 = arith.negf %102 : vector<8x128xf32>
    %104 = math.exp %103 : vector<8x128xf32>
    %cst_35 = arith.constant 1.000000e+00 : f32
    %105 = vector.broadcast %cst_35 : f32 to vector<8x128xf32>
    %106 = arith.addf %105, %104 : vector<8x128xf32>
    %107 = arith.divf %105, %106 : vector<8x128xf32>
    %108 = math.tanh %102 : vector<8x128xf32>
    %109 = arith.select %22, %108, %107 : vector<8x128xi1>, vector<8x128xf32>
    %110 = vector.extract_strided_slice %109 {offsets = [0, 0], sizes = [8, 32], strides = [1, 1]} : vector<8x128xf32> to vector<8x32xf32>
    %111 = vector.extract_strided_slice %109 {offsets = [0, 32], sizes = [8, 32], strides = [1, 1]} : vector<8x128xf32> to vector<8x32xf32>
    %112 = vector.extract_strided_slice %109 {offsets = [0, 64], sizes = [8, 32], strides = [1, 1]} : vector<8x128xf32> to vector<8x32xf32>
    %113 = vector.extract_strided_slice %109 {offsets = [0, 96], sizes = [8, 32], strides = [1, 1]} : vector<8x128xf32> to vector<8x32xf32>
    %114 = arith.mulf %111, %91 : vector<8x32xf32>
    %115 = arith.mulf %110, %112 : vector<8x32xf32>
    %116 = arith.addf %114, %115 : vector<8x32xf32>
    %117 = math.tanh %116 : vector<8x32xf32>
    %118 = arith.mulf %113, %117 : vector<8x32xf32>
    %119 = arith.index_cast %c3_i32 : i32 to index
    %c0_36 = arith.constant 0 : index
    %c0_37 = arith.constant 0 : index
    %120 = vector.load %arg5[%119, %c0_36, %c0_37] : memref<8x8x32xf32, #tpu.memory_space<vmem>>, vector<1x8x32xf32>
    %121 = vector.shape_cast %120 : vector<1x8x32xf32> to vector<8x32xf32>
    %122 = vector.shape_cast %118 : vector<8x32xf32> to vector<1x8x32xf32>
    tpu.vector_store %arg5[%119, %c0_36, %c0_37], %122 {strides = array<i32>} : memref<8x8x32xf32, #tpu.memory_space<vmem>>, vector<1x8x32xf32>,
    %c4_i32 = arith.constant 4 : i32
    %123 = arith.index_cast %c4_i32 : i32 to index
    %c0_38 = arith.constant 0 : index
    %c0_39 = arith.constant 0 : index
    %124 = vector.load %arg4[%123, %c0_38, %c0_39] : memref<8x8x128xf32, #tpu.memory_space<vmem>>, vector<1x8x128xf32>
    %125 = vector.shape_cast %124 : vector<1x8x128xf32> to vector<8x128xf32>
    %cst_40 = arith.constant dense<0.000000e+00> : vector<8x128xf32>
    %126 = tpu.matmul %118, %3, %cst_40 {dimension_numbers = #tpu.dot_dimension_numbers<[1], [0], [0], [1], [0, 0, 1, 1], [], []>} : vector<8x32xf32>, vector<32x128xf32>, vector<8x128xf32> -> vector<8x128xf32>
    %127 = arith.addf %125, %126 : vector<8x128xf32>
    %128 = arith.negf %127 : vector<8x128xf32>
    %129 = math.exp %128 : vector<8x128xf32>
    %cst_41 = arith.constant 1.000000e+00 : f32
    %130 = vector.broadcast %cst_41 : f32 to vector<8x128xf32>
    %131 = arith.addf %130, %129 : vector<8x128xf32>
    %132 = arith.divf %130, %131 : vector<8x128xf32>
    %133 = math.tanh %127 : vector<8x128xf32>
    %134 = arith.select %22, %133, %132 : vector<8x128xi1>, vector<8x128xf32>
    %135 = vector.extract_strided_slice %134 {offsets = [0, 0], sizes = [8, 32], strides = [1, 1]} : vector<8x128xf32> to vector<8x32xf32>
    %136 = vector.extract_strided_slice %134 {offsets = [0, 32], sizes = [8, 32], strides = [1, 1]} : vector<8x128xf32> to vector<8x32xf32>
    %137 = vector.extract_strided_slice %134 {offsets = [0, 64], sizes = [8, 32], strides = [1, 1]} : vector<8x128xf32> to vector<8x32xf32>
    %138 = vector.extract_strided_slice %134 {offsets = [0, 96], sizes = [8, 32], strides = [1, 1]} : vector<8x128xf32> to vector<8x32xf32>
    %139 = arith.mulf %136, %116 : vector<8x32xf32>
    %140 = arith.mulf %135, %137 : vector<8x32xf32>
    %141 = arith.addf %139, %140 : vector<8x32xf32>
    %142 = math.tanh %141 : vector<8x32xf32>
    %143 = arith.mulf %138, %142 : vector<8x32xf32>
    %144 = arith.index_cast %c4_i32 : i32 to index
    %c0_42 = arith.constant 0 : index
    %c0_43 = arith.constant 0 : index
    %145 = vector.load %arg5[%144, %c0_42, %c0_43] : memref<8x8x32xf32, #tpu.memory_space<vmem>>, vector<1x8x32xf32>
    %146 = vector.shape_cast %145 : vector<1x8x32xf32> to vector<8x32xf32>
    %147 = vector.shape_cast %143 : vector<8x32xf32> to vector<1x8x32xf32>
    tpu.vector_store %arg5[%144, %c0_42, %c0_43], %147 {strides = array<i32>} : memref<8x8x32xf32, #tpu.memory_space<vmem>>, vector<1x8x32xf32>,
    %c5_i32 = arith.constant 5 : i32
    %148 = arith.index_cast %c5_i32 : i32 to index
    %c0_44 = arith.constant 0 : index
    %c0_45 = arith.constant 0 : index
    %149 = vector.load %arg4[%148, %c0_44, %c0_45] : memref<8x8x128xf32, #tpu.memory_space<vmem>>, vector<1x8x128xf32>
    %150 = vector.shape_cast %149 : vector<1x8x128xf32> to vector<8x128xf32>
    %cst_46 = arith.constant dense<0.000000e+00> : vector<8x128xf32>
    %151 = tpu.matmul %143, %3, %cst_46 {dimension_numbers = #tpu.dot_dimension_numbers<[1], [0], [0], [1], [0, 0, 1, 1], [], []>} : vector<8x32xf32>, vector<32x128xf32>, vector<8x128xf32> -> vector<8x128xf32>
    %152 = arith.addf %150, %151 : vector<8x128xf32>
    %153 = arith.negf %152 : vector<8x128xf32>
    %154 = math.exp %153 : vector<8x128xf32>
    %cst_47 = arith.constant 1.000000e+00 : f32
    %155 = vector.broadcast %cst_47 : f32 to vector<8x128xf32>
    %156 = arith.addf %155, %154 : vector<8x128xf32>
    %157 = arith.divf %155, %156 : vector<8x128xf32>
    %158 = math.tanh %152 : vector<8x128xf32>
    %159 = arith.select %22, %158, %157 : vector<8x128xi1>, vector<8x128xf32>
    %160 = vector.extract_strided_slice %159 {offsets = [0, 0], sizes = [8, 32], strides = [1, 1]} : vector<8x128xf32> to vector<8x32xf32>
    %161 = vector.extract_strided_slice %159 {offsets = [0, 32], sizes = [8, 32], strides = [1, 1]} : vector<8x128xf32> to vector<8x32xf32>
    %162 = vector.extract_strided_slice %159 {offsets = [0, 64], sizes = [8, 32], strides = [1, 1]} : vector<8x128xf32> to vector<8x32xf32>
    %163 = vector.extract_strided_slice %159 {offsets = [0, 96], sizes = [8, 32], strides = [1, 1]} : vector<8x128xf32> to vector<8x32xf32>
    %164 = arith.mulf %161, %141 : vector<8x32xf32>
    %165 = arith.mulf %160, %162 : vector<8x32xf32>
    %166 = arith.addf %164, %165 : vector<8x32xf32>
    %167 = math.tanh %166 : vector<8x32xf32>
    %168 = arith.mulf %163, %167 : vector<8x32xf32>
    %169 = arith.index_cast %c5_i32 : i32 to index
    %c0_48 = arith.constant 0 : index
    %c0_49 = arith.constant 0 : index
    %170 = vector.load %arg5[%169, %c0_48, %c0_49] : memref<8x8x32xf32, #tpu.memory_space<vmem>>, vector<1x8x32xf32>
    %171 = vector.shape_cast %170 : vector<1x8x32xf32> to vector<8x32xf32>
    %172 = vector.shape_cast %168 : vector<8x32xf32> to vector<1x8x32xf32>
    tpu.vector_store %arg5[%169, %c0_48, %c0_49], %172 {strides = array<i32>} : memref<8x8x32xf32, #tpu.memory_space<vmem>>, vector<1x8x32xf32>,
    %c6_i32 = arith.constant 6 : i32
    %173 = arith.index_cast %c6_i32 : i32 to index
    %c0_50 = arith.constant 0 : index
    %c0_51 = arith.constant 0 : index
    %174 = vector.load %arg4[%173, %c0_50, %c0_51] : memref<8x8x128xf32, #tpu.memory_space<vmem>>, vector<1x8x128xf32>
    %175 = vector.shape_cast %174 : vector<1x8x128xf32> to vector<8x128xf32>
    %cst_52 = arith.constant dense<0.000000e+00> : vector<8x128xf32>
    %176 = tpu.matmul %168, %3, %cst_52 {dimension_numbers = #tpu.dot_dimension_numbers<[1], [0], [0], [1], [0, 0, 1, 1], [], []>} : vector<8x32xf32>, vector<32x128xf32>, vector<8x128xf32> -> vector<8x128xf32>
    %177 = arith.addf %175, %176 : vector<8x128xf32>
    %178 = arith.negf %177 : vector<8x128xf32>
    %179 = math.exp %178 : vector<8x128xf32>
    %cst_53 = arith.constant 1.000000e+00 : f32
    %180 = vector.broadcast %cst_53 : f32 to vector<8x128xf32>
    %181 = arith.addf %180, %179 : vector<8x128xf32>
    %182 = arith.divf %180, %181 : vector<8x128xf32>
    %183 = math.tanh %177 : vector<8x128xf32>
    %184 = arith.select %22, %183, %182 : vector<8x128xi1>, vector<8x128xf32>
    %185 = vector.extract_strided_slice %184 {offsets = [0, 0], sizes = [8, 32], strides = [1, 1]} : vector<8x128xf32> to vector<8x32xf32>
    %186 = vector.extract_strided_slice %184 {offsets = [0, 32], sizes = [8, 32], strides = [1, 1]} : vector<8x128xf32> to vector<8x32xf32>
    %187 = vector.extract_strided_slice %184 {offsets = [0, 64], sizes = [8, 32], strides = [1, 1]} : vector<8x128xf32> to vector<8x32xf32>
    %188 = vector.extract_strided_slice %184 {offsets = [0, 96], sizes = [8, 32], strides = [1, 1]} : vector<8x128xf32> to vector<8x32xf32>
    %189 = arith.mulf %186, %166 : vector<8x32xf32>
    %190 = arith.mulf %185, %187 : vector<8x32xf32>
    %191 = arith.addf %189, %190 : vector<8x32xf32>
    %192 = math.tanh %191 : vector<8x32xf32>
    %193 = arith.mulf %188, %192 : vector<8x32xf32>
    %194 = arith.index_cast %c6_i32 : i32 to index
    %c0_54 = arith.constant 0 : index
    %c0_55 = arith.constant 0 : index
    %195 = vector.load %arg5[%194, %c0_54, %c0_55] : memref<8x8x32xf32, #tpu.memory_space<vmem>>, vector<1x8x32xf32>
    %196 = vector.shape_cast %195 : vector<1x8x32xf32> to vector<8x32xf32>
    %197 = vector.shape_cast %193 : vector<8x32xf32> to vector<1x8x32xf32>
    tpu.vector_store %arg5[%194, %c0_54, %c0_55], %197 {strides = array<i32>} : memref<8x8x32xf32, #tpu.memory_space<vmem>>, vector<1x8x32xf32>,
    %c7_i32 = arith.constant 7 : i32
    %198 = arith.index_cast %c7_i32 : i32 to index
    %c0_56 = arith.constant 0 : index
    %c0_57 = arith.constant 0 : index
    %199 = vector.load %arg4[%198, %c0_56, %c0_57] : memref<8x8x128xf32, #tpu.memory_space<vmem>>, vector<1x8x128xf32>
    %200 = vector.shape_cast %199 : vector<1x8x128xf32> to vector<8x128xf32>
    %cst_58 = arith.constant dense<0.000000e+00> : vector<8x128xf32>
    %201 = tpu.matmul %193, %3, %cst_58 {dimension_numbers = #tpu.dot_dimension_numbers<[1], [0], [0], [1], [0, 0, 1, 1], [], []>} : vector<8x32xf32>, vector<32x128xf32>, vector<8x128xf32> -> vector<8x128xf32>
    %202 = arith.addf %200, %201 : vector<8x128xf32>
    %203 = arith.negf %202 : vector<8x128xf32>
    %204 = math.exp %203 : vector<8x128xf32>
    %cst_59 = arith.constant 1.000000e+00 : f32
    %205 = vector.broadcast %cst_59 : f32 to vector<8x128xf32>
    %206 = arith.addf %205, %204 : vector<8x128xf32>
    %207 = arith.divf %205, %206 : vector<8x128xf32>
    %208 = math.tanh %202 : vector<8x128xf32>
    %209 = arith.select %22, %208, %207 : vector<8x128xi1>, vector<8x128xf32>
    %210 = vector.extract_strided_slice %209 {offsets = [0, 0], sizes = [8, 32], strides = [1, 1]} : vector<8x128xf32> to vector<8x32xf32>
    %211 = vector.extract_strided_slice %209 {offsets = [0, 32], sizes = [8, 32], strides = [1, 1]} : vector<8x128xf32> to vector<8x32xf32>
    %212 = vector.extract_strided_slice %209 {offsets = [0, 64], sizes = [8, 32], strides = [1, 1]} : vector<8x128xf32> to vector<8x32xf32>
    %213 = vector.extract_strided_slice %209 {offsets = [0, 96], sizes = [8, 32], strides = [1, 1]} : vector<8x128xf32> to vector<8x32xf32>
    %214 = arith.mulf %211, %191 : vector<8x32xf32>
    %215 = arith.mulf %210, %212 : vector<8x32xf32>
    %216 = arith.addf %214, %215 : vector<8x32xf32>
    %217 = math.tanh %216 : vector<8x32xf32>
    %218 = arith.mulf %213, %217 : vector<8x32xf32>
    %219 = arith.index_cast %c7_i32 : i32 to index
    %c0_60 = arith.constant 0 : index
    %c0_61 = arith.constant 0 : index
    %220 = vector.load %arg5[%219, %c0_60, %c0_61] : memref<8x8x32xf32, #tpu.memory_space<vmem>>, vector<1x8x32xf32>
    %221 = vector.shape_cast %220 : vector<1x8x32xf32> to vector<8x32xf32>
    %222 = vector.shape_cast %218 : vector<8x32xf32> to vector<1x8x32xf32>
    tpu.vector_store %arg5[%219, %c0_60, %c0_61], %222 {strides = array<i32>} : memref<8x8x32xf32, #tpu.memory_space<vmem>>, vector<1x8x32xf32>,
    %c8_i32 = arith.constant 8 : i32
    %c72 = arith.constant 72 : index
    %c0_62 = arith.constant 0 : index
    %223 = vector.load %arg2[%c72, %c0_62] : memref<112x128xf32, #tpu.memory_space<vmem>>, vector<32x128xf32>
    %c104 = arith.constant 104 : index
    %c0_63 = arith.constant 0 : index
    %224 = vector.load %arg2[%c104, %c0_63] : memref<112x128xf32, #tpu.memory_space<vmem>>, vector<1x128xf32>
    %c0_64 = arith.constant 0 : index
    %c0_65 = arith.constant 0 : index
    %c0_66 = arith.constant 0 : index
    %225 = vector.load %arg5[%c0_64, %c0_65, %c0_66] : memref<8x8x32xf32, #tpu.memory_space<vmem>>, vector<8x8x32xf32>
    %226 = vector.shape_cast %225 : vector<8x8x32xf32> to vector<64x32xf32>
    %cst_67 = arith.constant dense<0.000000e+00> : vector<64x128xf32>
    %227 = tpu.matmul %226, %223, %cst_67 {dimension_numbers = #tpu.dot_dimension_numbers<[1], [0], [0], [1], [0, 0, 1, 1], [], []>} : vector<64x32xf32>, vector<32x128xf32>, vector<64x128xf32> -> vector<64x128xf32>
    %228 = vector.broadcast %224 : vector<1x128xf32> to vector<64x128xf32>
    %229 = arith.addf %227, %228 : vector<64x128xf32>
    %c0_68 = arith.constant 0 : index
    %c0_69 = arith.constant 0 : index
    %230 = vector.load %arg3[%c0_68, %c0_69] : memref<64x128xf32, #tpu.memory_space<vmem>>, vector<64x128xf32>
    tpu.vector_store %arg3[%c0_68, %c0_69], %229 {strides = array<i32>} : memref<64x128xf32, #tpu.memory_space<vmem>>, vector<64x128xf32>,
    return
  }
}

</mosaic_0001>

<bundles_post_ra>
// kernel: decode_forward.1
= control target key start
LH: loop header
LB: loop body
LE: loop exit
PB: predicated region body
PF: predicated region fallthrough
CT: control target
= control target key end

     0   :  { %vm28_vm0 = vcmask 64512   ;;  %v1623_v0 = vmov 0.0   ;;  %vm1624_vm1 = vmmov 0   ;;  %vm114_vm2 = vcmask 130048   ;;  %s1626_s12 = smov 64   ;;  %s1627_s13 = smov 32   ;;  %s1922_s2 = inlined_call_operand.vmem [shape: f32[112,128], index: 2, kind: input, shape index: {}]   ;;  %s1923_s1 = inlined_call_operand.vmem [shape: f32[8,8], index: 1, kind: input, shape index: {}]   ;;  %s1924_s0 = inlined_call_operand.vmem [shape: f32[64,16], index: 0, kind: input, shape index: {}]   ;;  %s1925_s3 = inlined_call_operand.vmem [shape: f32[64,128], index: 3, kind: output, shape index: {}]  }
   0x1   :  { %1363 = vmatprep.subr.mxu0 %v1623_v0  ;;  %v14_v1 = vld [vmem:[%s1922_s2] sm:$0xff]  ;;  %1365 = vmatprep.mubr.msk.f32.mxu0 %vm1624_vm1, %v1623_v0  ;;  %v16_v3 = vld [vmem:[%s1922_s2 + $0x10] sm:$0xff]  ;;  %v17_v4 = vld [vmem:[%s1922_s2 + $0x18] sm:$0xff]  ;;  %v1625_v11 = vmov 0.0|0.0   ;;  %vm258_vm3 = vcmask 261120   ;;  %v252_v32 = vlaneseq }
   0x2   :  { %v23_v2 = vld [vmem:[%s1923_s1] sm:$0xff]  ;;  %1364 = vmatpush3.msra.mxu0 %v14_v1  ;;  %v1492_v6 = vpack.c.bf16 %v17_v4, %v16_v3  ;;  %v19_v8 = vld [vmem:[%s1922_s2 + $0x28] sm:$0xff]  ;;  %v104_v12 = vld [vmem:[%s1924_s0 + $0x10] sm:$0xff] }
   0x3   :  { %v102_v5 = vld [vmem:[%s1924_s0] sm:$0xff]  ;;  %1366 = vmatmul.mubr.msk.f32.vlgmr.msra.gmra.mrb[0].mxu0 %vm28_vm0, %v23_v2  ;;  %v103_v9 = vld [vmem:[%s1924_s0 + $0x8] sm:$0xff]  ;;  %v20_v13 = vld [vmem:[%s1922_s2 + $0x30] sm:$0xff]  ;;  %v253_v34 = vand.u32 127, %v252_v32 }
   0x4   :  { %v18_v7 = vld [vmem:[%s1922_s2 + $0x20] sm:$0xff]  ;;  %1372 = vmatprep.mubr.msk.f32.mxu0 %vm114_vm2, %v102_v5  ;;  %1493 = vmatprep.subr.bf16.mxu0 %v1492_v6  ;;  %v21_v14 = vld [vmem:[%s1922_s2 + $0x38] sm:$0xff]  ;;  %v1263_v17 = vld [vmem:[%s1922_s2 + $0x8] ss:$0 sm:$0xff] }
   0x5   :  { %1552 = vmatprep.subr.bf16.mxu1 %v1492_v6  ;;  %1495 = vmatpush3.bf16.msra.mxu0 %v1492_v6  ;;  %v1676_v10 = vpack.c.bf16 %v19_v8, %v18_v7  ;;  %v105_v15 = vld [vmem:[%s1924_s0 + $0x18] sm:$0xff]  ;;  %v1695_v16 = vpack.c.bf16 %v21_v14, %v20_v13  ;;  %v1720_v25 = vld [vmem:[%s1922_s2 + $0x40] ss:$0 sm:$0xff]  ;;  %vm254_vm4 = vcmp.ge.s32.totalorder %v253_v34, 64  ;;  %vm255_vm5 = vcmp.lt.s32.totalorder %v253_v34, 96  ;;  %v107_v1 = vld [vmem:[%s1924_s0 + $0x28] sm:$0xff] }
   0x6   :  { %1553 = vmatpush3.bf16.msra.mxu1 %v1492_v6  ;;  %1496 = vmatprep.subr.bf16.mxu0 %v1625_v11  ;;  %vm1723_vm6 = vmand %vm254_vm4, %vm255_vm5  ;;  %v106_v63 = vld [vmem:[%s1924_s0 + $0x20] sm:$0xff]  ;;  %v108_v2 = vld [vmem:[%s1924_s0 + $0x30] sm:$0xff] }
   0x7   :  { %1508 = vmatprep.subr.bf16.mxu1 %v1625_v11  ;;  %1378 = vmatprep.mubr.msk.f32.mxu1 %vm114_vm2, %v106_v63  ;;  %v109_v3 = vld [vmem:[%s1924_s0 + $0x38] sm:$0xff] }
   0x8   :  { %1373 = vmatmul.mubr.msk.f32.vlgmr.msra.gmra.mrb[2].mxu0 %vm114_vm2, %v103_v9 }
   0x9   :  { %1498 = vmatpush3.bf16.msra.mxu0 %v1676_v10  ;;  %1375 = vmatprep.mubr.msk.f32.mxu0 %vm114_vm2, %v104_v12 }
   0xa   :  { %1499 = vmatprep.subr.bf16.mxu0 %v1625_v11  ;;  %1379 = vmatmul.mubr.msk.f32.vlgmr.msra.gmra.mrb[0].mxu1 %vm114_vm2, %v107_v1 }
   0xb   :  { %1510 = vmatpush3.bf16.msra.mxu1 %v1676_v10  ;;  %1381 = vmatprep.mubr.msk.f32.mxu1 %vm114_vm2, %v108_v2 }
   0xc   :  { %1376 = vmatmul.mubr.msk.f32.gmra.mrb[4].mxu0 %vm114_vm2, %v105_v15  ;;  %1511 = vmatprep.subr.bf16.mxu1 %v1625_v11 }
   0xd   :  { %1501 = vmatpush3.bf16.msra.mxu0 %v1695_v16  ;;  %1392 = vmatprep.mubr.msk.f32.mxu0 %vm1624_vm1, %v1623_v0 }
   0xe   :  { %1502 = vmatprep.subr.bf16.mxu0 %v1625_v11  ;;  %1382 = vmatmul.mubr.msk.f32.gmra.mrb[2].mxu1 %vm114_vm2, %v109_v3 }
   0xf   :  { %1513 = vmatpush3.bf16.msra.mxu1 %v1695_v16  ;;  %1414 = vmatprep.mubr.msk.f32.mxu1 %vm1624_vm1, %v1623_v0 }
  0x10   :  { %1520 = vmatprep.subr.bf16.mxu1 %v1625_v11 }
  0xd6   :  { %v98_v18 = vpop.f32.mrb[0].mxu0 }
  0xd7   :  { %v99_v19 = vadd.f32 %v1263_v17, %v98_v18  ;;  %v1367_v20 = vpop.f32.mrb[1].mxu0 }
  0xd9   :  { %1393 = vmatmul.mubr.msk.f32.vlgmr.msra.gmra.mrb[6].mxu0 %vm258_vm3, %v99_v19 }
  0xda   :  { %1504 = vmatpush3.bf16.msra.mxu0 %v1676_v10  ;;  %1403 = vmatprep.mubr.msk.f32.mxu0 %vm1624_vm1, %v1623_v0 }
  0xdb   :  { %1505 = vmatprep.subr.bf16.mxu0 %v1625_v11  ;;  %v1374_v21 = vpop.f32.mrb[2].mxu0 }
  0xdc   :  { %v205_v22 = vpop.f32.mrb[3].mxu0  ;;  %v211_v48 = vadd.f32 %v1374_v21, %v1720_v25 }
  0xdd   :  { %v206_v26 = vadd.f32 %v1720_v25, %v205_v22  ;;  %v1770_v7 = vpop.f32.mrb[0].mxu1 }
  0xde   :  { %1507 = vmatpush3.bf16.msra.mxu0 %v1695_v16  ;;  %v1772_v8 = vpop.f32.mrb[1].mxu1 }
  0xdf   :  { %1514 = vmatprep.subr.bf16.mxu0 %v1625_v11  ;;  %v1713_v23 = vpop.f32.mrb[4].mxu0 }
  0xe0   :  { %v1715_v24 = vpop.f32.mrb[5].mxu0 }
  0xe1   :  { %v1774_v9 = vpop.f32.mrb[2].mxu1  ;;  %v216_v14 = vadd.f32 %v1720_v25, %v1715_v24 }
  0xe2   :  { %v1776_v12 = vpop.f32.mrb[3].mxu1 }
 0x1ac   :  { %v328_v27 = vpop.f32.mrb[6].mxu0 }
 0x1ad   :  { %v332_v28 = vadd.f32 %v328_v27, %v206_v26  ;;  %v1394_v29 = vpop.f32.mrb[7].mxu0 }
 0x1af   :  { %v1275_v30 = vmul.f32 -1.442695, %v332_v28 }
 0x1b1   :  { %1559 = vpow2.f32 %v1275_v30 }
 0x1b2   :  { %1561 = vtanh.f32 %v332_v28 }
 0x1bb   :  { %v1560_v31 = vpop.eup %1559 }
 0x1bc   :  { %v336_v33 = vadd.f32 1.0, %v1560_v31  ;;  %v1562_v36 = vpop.eup %1561 }
 0x1be   :  { %1563 = vrcp.f32 %v336_v33 }
 0x1c8   :  { %v1564_v37 = vpop.eup %1563 }
 0x1c9   :  { %v340_v38 = vsel %vm1723_vm6, %v1562_v36, %v1564_v37  ;;  %v221_v37 = vadd.f32 %v1713_v23, %v1720_v25 }
 0x1ca   :  { %343 = vrot.lane.b32.xlu0 %v340_v38, %s1626_s12  ;;  %v341_v41 = vmul.f32 0.0, %v340_v38 }
 0x23c   :  { %v344_v39 = vpop.permute.xlu0 %343 }
 0x23d   :  { %v346_v40 = vmul.f32 %v344_v39, %v340_v38 }
 0x23f   :  { %348 = vrot.lane.b32.xlu0 %v346_v40, %s1627_s13 }
 0x2b1   :  { %v349_v42 = vpop.permute.xlu0 %348 }
 0x2b2   :  { %v351_v43 = vadd.f32 %v349_v42, %v341_v41 }
 0x2b4   :  { %1565 = vtanh.f32 %v351_v43 }
 0x2be   :  { %v1566_v44 = vpop.eup %1565 }
 0x2bf   :  { %354 = vrot.lane.b32.xlu1 %v1566_v44, %s1626_s12 }
 0x331   :  { %v355_v45 = vpop.permute.xlu1 %354 }
 0x332   :  { %v357_v46 = vmul.f32 %v355_v45, %v340_v38 }
 0x334   :  { %359 = vrot.lane.b32.xlu1 %v357_v46, %s1627_s13 }
 0x3a6   :  { %v360_v47 = vpop.permute.xlu1 %359 }
 0x3a7   :  { %362 = vst.msk [vmem:[#allocation3] sm:$0xff] %vm258_vm3, %v360_v47  ;;  %1404 = vmatmul.mubr.msk.f32.vlgmr.msra.gmra.mrb[8].mxu0 %vm258_vm3, %v360_v47 }
 0x3a8   :  { %1516 = vmatpush3.bf16.msra.mxu0 %v1676_v10  ;;  %1425 = vmatprep.mubr.msk.f32.mxu0 %vm1624_vm1, %v1623_v0 }
 0x3a9   :  { %1517 = vmatprep.subr.bf16.mxu0 %v1625_v11 }
 0x3ac   :  { %1519 = vmatpush3.bf16.msra.mxu0 %v1695_v16 }
 0x3ad   :  { %1526 = vmatprep.subr.bf16.mxu0 %v1625_v11 }
 0x47a   :  { %v433_v49 = vpop.f32.mrb[8].mxu0 }
 0x47b   :  { %v437_v50 = vadd.f32 %v433_v49, %v211_v48  ;;  %v1405_v51 = vpop.f32.mrb[9].mxu0 }
 0x47d   :  { %v1277_v52 = vmul.f32 -1.442695, %v437_v50 }
 0x47f   :  { %1567 = vpow2.f32 %v1277_v52 }
 0x480   :  { %1569 = vtanh.f32 %v437_v50 }
 0x489   :  { %v1568_v53 = vpop.eup %1567 }
 0x48a   :  { %v441_v54 = vadd.f32 1.0, %v1568_v53  ;;  %v1570_v55 = vpop.eup %1569 }
 0x48c   :  { %1571 = vrcp.f32 %v441_v54 }
 0x496   :  { %v1572_v56 = vpop.eup %1571 }
 0x497   :  { %v445_v57 = vsel %vm1723_vm6, %v1570_v55, %v1572_v56  ;;  %v226_v55 = vadd.f32 %v1720_v25, %v1772_v8 }
 0x498   :  { %448 = vrot.lane.b32.xlu0 %v445_v57, %s1626_s12  ;;  %v446_v60 = vmul.f32 %v445_v57, %v351_v43 }
 0x50a   :  { %v449_v58 = vpop.permute.xlu0 %448 }
 0x50b   :  { %v451_v59 = vmul.f32 %v449_v58, %v445_v57 }
 0x50d   :  { %453 = vrot.lane.b32.xlu1 %v451_v59, %s1627_s13 }
 0x57f   :  { %v454_v61 = vpop.permute.xlu1 %453 }
 0x580   :  { %v456_v62 = vadd.f32 %v454_v61, %v446_v60 }
 0x582   :  { %1573 = vtanh.f32 %v456_v62 }
 0x58c   :  { %v1574_v4 = vpop.eup %1573 }
 0x58d   :  { %459 = vrot.lane.b32.xlu0 %v1574_v4, %s1626_s12 }
 0x5ff   :  { %v460_v5 = vpop.permute.xlu0 %459 }
 0x600   :  { %v462_v6 = vmul.f32 %v460_v5, %v445_v57 }
 0x602   :  { %464 = vrot.lane.b32.xlu1 %v462_v6, %s1627_s13 }
 0x674   :  { %v465_v13 = vpop.permute.xlu1 %464 }
 0x675   :  { %468 = vst.msk [vmem:[#allocation3 + $0x8] sm:$0xff] %vm258_vm3, %v465_v13  ;;  %1415 = vmatmul.mubr.msk.f32.vlgmr.msra.gmra.mrb[4].mxu1 %vm258_vm3, %v465_v13 }
 0x676   :  { %1522 = vmatpush3.bf16.msra.mxu1 %v1676_v10  ;;  %1436 = vmatprep.mubr.msk.f32.mxu1 %vm1624_vm1, %v1623_v0 }
 0x677   :  { %1523 = vmatprep.subr.bf16.mxu1 %v1625_v11 }
 0x67a   :  { %1525 = vmatpush3.bf16.msra.mxu1 %v1695_v16 }
 0x67b   :  { %1532 = vmatprep.subr.bf16.mxu1 %v1625_v11 }
 0x748   :  { %v539_v15 = vpop.f32.mrb[4].mxu1 }
 0x749   :  { %v543_v17 = vadd.f32 %v539_v15, %v216_v14  ;;  %v1416_v18 = vpop.f32.mrb[5].mxu1 }
 0x74b   :  { %v1279_v19 = vmul.f32 -1.442695, %v543_v17 }
 0x74d   :  { %1575 = vpow2.f32 %v1279_v19 }
 0x74e   :  { %1577 = vtanh.f32 %v543_v17  ;;  %v231_v17 = vadd.f32 %v1770_v7, %v1720_v25 }
 0x757   :  { %v1576_v20 = vpop.eup %1575 }
 0x758   :  { %v547_v21 = vadd.f32 1.0, %v1576_v20  ;;  %v1578_v22 = vpop.eup %1577 }
 0x75a   :  { %1579 = vrcp.f32 %v547_v21 }
 0x764   :  { %v1580_v26 = vpop.eup %1579 }
 0x765   :  { %v551_v27 = vsel %vm1723_vm6, %v1578_v22, %v1580_v26 }
 0x766   :  { %554 = vrot.lane.b32.xlu0 %v551_v27, %s1626_s12  ;;  %v552_v24 = vmul.f32 %v551_v27, %v456_v62 }
 0x7d8   :  { %v555_v28 = vpop.permute.xlu0 %554 }
 0x7d9   :  { %v557_v29 = vmul.f32 %v555_v28, %v551_v27 }
 0x7db   :  { %559 = vrot.lane.b32.xlu1 %v557_v29, %s1627_s13 }
 0x84d   :  { %v560_v30 = vpop.permute.xlu1 %559 }
 0x84e   :  { %v562_v31 = vadd.f32 %v560_v30, %v552_v24  ;;  %v1105_v24 = vld [vmem:[%s1922_s2 + $0x48] sm:$0xff]  ;;  %v1106_v30 = vld [vmem:[%s1922_s2 + $0x50] sm:$0xff] }
 0x850   :  { %1581 = vtanh.f32 %v562_v31 }
 0x85a   :  { %v1582_v32 = vpop.eup %1581 }
 0x85b   :  { %565 = vrot.lane.b32.xlu0 %v1582_v32, %s1626_s12 }
 0x8cd   :  { %v566_v33 = vpop.permute.xlu0 %565 }
 0x8ce   :  { %v568_v34 = vmul.f32 %v566_v33, %v551_v27 }
 0x8d0   :  { %570 = vrot.lane.b32.xlu1 %v568_v34, %s1627_s13 }
 0x942   :  { %v571_v36 = vpop.permute.xlu1 %570 }
 0x943   :  { %574 = vst.msk [vmem:[#allocation3 + $0x10] sm:$0xff] %vm258_vm3, %v571_v36  ;;  %1426 = vmatmul.mubr.msk.f32.vlgmr.msra.gmra.mrb[10].mxu0 %vm258_vm3, %v571_v36  ;;  %v1107_v36 = vld [vmem:[%s1922_s2 + $0x58] sm:$0xff] }
 0x944   :  { %1528 = vmatpush3.bf16.msra.mxu0 %v1676_v10  ;;  %1447 = vmatprep.mubr.msk.f32.mxu0 %vm1624_vm1, %v1623_v0 }
 0x945   :  { %1529 = vmatprep.subr.bf16.mxu0 %v1625_v11 }
 0x948   :  { %1531 = vmatpush3.bf16.msra.mxu0 %v1695_v16 }
 0x949   :  { %1538 = vmatprep.subr.bf16.mxu0 %v1625_v11 }
 0xa16   :  { %v645_v38 = vpop.f32.mrb[10].mxu0 }
 0xa17   :  { %v649_v39 = vadd.f32 %v645_v38, %v221_v37  ;;  %v1427_v40 = vpop.f32.mrb[11].mxu0  ;;  %v1108_v37 = vld [vmem:[%s1922_s2 + $0x60] sm:$0xff] }
 0xa18   :  { %v1548_v38 = vpack.c.bf16 %v1108_v37, %v1107_v36  ;;  %v1110_v40 = vld [vmem:[#allocation3] sm:$0xff] }
 0xa19   :  { %v1281_v41 = vmul.f32 -1.442695, %v649_v39 }
 0xa1b   :  { %1583 = vpow2.f32 %v1281_v41  ;;  %v1111_v41 = vld [vmem:[#allocation3 + $0x8] sm:$0xff] }
 0xa1c   :  { %1585 = vtanh.f32 %v649_v39 }
 0xa25   :  { %v1584_v42 = vpop.eup %1583 }
 0xa26   :  { %v653_v43 = vadd.f32 1.0, %v1584_v42  ;;  %v1586_v44 = vpop.eup %1585  ;;  %v1112_v42 = vld [vmem:[#allocation3 + $0x10] sm:$0xff] }
 0xa28   :  { %1587 = vrcp.f32 %v653_v43 }
 0xa32   :  { %v1588_v45 = vpop.eup %1587 }
 0xa33   :  { %v657_v46 = vsel %vm1723_vm6, %v1586_v44, %v1588_v45 }
 0xa34   :  { %660 = vrot.lane.b32.xlu0 %v657_v46, %s1626_s12  ;;  %v658_v23 = vmul.f32 %v657_v46, %v562_v31  ;;  %v1544_v31 = vpack.c.bf16 %v1106_v30, %v1105_v24 }
 0xaa6   :  { %v661_v47 = vpop.permute.xlu0 %660 }
 0xaa7   :  { %v663_v48 = vmul.f32 %v661_v47, %v657_v46 }
 0xaa9   :  { %665 = vrot.lane.b32.xlu1 %v663_v48, %s1627_s13 }
 0xb1b   :  { %v666_v49 = vpop.permute.xlu1 %665 }
 0xb1c   :  { %v668_v50 = vadd.f32 %v666_v49, %v658_v23 }
 0xb1e   :  { %1589 = vtanh.f32 %v668_v50 }
 0xb28   :  { %v1590_v51 = vpop.eup %1589 }
 0xb29   :  { %671 = vrot.lane.b32.xlu0 %v1590_v51, %s1626_s12 }
 0xb9b   :  { %v672_v52 = vpop.permute.xlu0 %671 }
 0xb9c   :  { %v674_v53 = vmul.f32 %v672_v52, %v657_v46  ;;  %v236_v46 = vadd.f32 %v1720_v25, %v1776_v12 }
 0xb9e   :  { %676 = vrot.lane.b32.xlu1 %v674_v53, %s1627_s13 }
 0xc10   :  { %v677_v54 = vpop.permute.xlu1 %676 }
 0xc11   :  { %680 = vst.msk [vmem:[#allocation3 + $0x18] sm:$0xff] %vm258_vm3, %v677_v54  ;;  %1437 = vmatmul.mubr.msk.f32.vlgmr.msra.gmra.mrb[6].mxu1 %vm258_vm3, %v677_v54 }
 0xc12   :  { %1534 = vmatpush3.bf16.msra.mxu1 %v1676_v10  ;;  %1458 = vmatprep.mubr.msk.f32.mxu1 %vm1624_vm1, %v1623_v0 }
 0xc13   :  { %1535 = vmatprep.subr.bf16.mxu1 %v1625_v11 }
 0xc16   :  { %1537 = vmatpush3.bf16.msra.mxu1 %v1695_v16 }
 0xc17   :  { %1545 = vmatprep.subr.bf16.mxu1 %v1544_v31 }
 0xc18   :  { %v1113_v43 = vld [vmem:[#allocation3 + $0x18] sm:$0xff] }
 0xce4   :  { %v751_v56 = vpop.f32.mrb[6].mxu1 }
 0xce5   :  { %v755_v57 = vadd.f32 %v751_v56, %v226_v55  ;;  %v1438_v58 = vpop.f32.mrb[7].mxu1 }
 0xce7   :  { %v1283_v59 = vmul.f32 -1.442695, %v755_v57 }
 0xce9   :  { %1591 = vpow2.f32 %v1283_v59 }
 0xcea   :  { %1593 = vtanh.f32 %v755_v57 }
 0xcf3   :  { %v1592_v60 = vpop.eup %1591 }
 0xcf4   :  { %v759_v61 = vadd.f32 1.0, %v1592_v60  ;;  %v1594_v62 = vpop.eup %1593 }
 0xcf6   :  { %1595 = vrcp.f32 %v759_v61 }
 0xd00   :  { %v1596_v63 = vpop.eup %1595 }
 0xd01   :  { %v763_v1 = vsel %vm1723_vm6, %v1594_v62, %v1596_v63 }
 0xd02   :  { %766 = vrot.lane.b32.xlu0 %v763_v1, %s1626_s12  ;;  %v764_v4 = vmul.f32 %v763_v1, %v668_v50  ;;  %v1868_v50 = vld [vmem:[%s1922_s2 + $0x68] ss:$0 sm:$0xff] }
 0xd74   :  { %v767_v2 = vpop.permute.xlu0 %766 }
 0xd75   :  { %v769_v3 = vmul.f32 %v767_v2, %v763_v1 }
 0xd77   :  { %771 = vrot.lane.b32.xlu1 %v769_v3, %s1627_s13 }
 0xde9   :  { %v772_v5 = vpop.permute.xlu1 %771 }
 0xdea   :  { %v774_v6 = vadd.f32 %v772_v5, %v764_v4 }
 0xdec   :  { %1597 = vtanh.f32 %v774_v6 }
 0xdf6   :  { %v1598_v8 = vpop.eup %1597 }
 0xdf7   :  { %777 = vrot.lane.b32.xlu0 %v1598_v8, %s1626_s12 }
 0xe69   :  { %v778_v13 = vpop.permute.xlu0 %777 }
 0xe6a   :  { %v780_v14 = vmul.f32 %v778_v13, %v763_v1 }
 0xe6c   :  { %782 = vrot.lane.b32.xlu1 %v780_v14, %s1627_s13 }
 0xede   :  { %v783_v15 = vpop.permute.xlu1 %782 }
 0xedf   :  { %786 = vst.msk [vmem:[#allocation3 + $0x20] sm:$0xff] %vm258_vm3, %v783_v15  ;;  %1448 = vmatmul.mubr.msk.f32.vlgmr.msra.gmra.mrb[12].mxu0 %vm258_vm3, %v783_v15 }
 0xee0   :  { %1540 = vmatpush3.bf16.msra.mxu0 %v1676_v10  ;;  %1469 = vmatprep.mubr.msk.f32.mxu0 %vm1624_vm1, %v1623_v0 }
 0xee1   :  { %1541 = vmatprep.subr.bf16.mxu0 %v1625_v11 }
 0xee4   :  { %1543 = vmatpush3.bf16.msra.mxu0 %v1695_v16 }
 0xee6   :  { %v1114_v44 = vld [vmem:[#allocation3 + $0x20] sm:$0xff] }
 0xfb2   :  { %v857_v18 = vpop.f32.mrb[12].mxu0 }
 0xfb3   :  { %v861_v19 = vadd.f32 %v857_v18, %v231_v17  ;;  %v1449_v20 = vpop.f32.mrb[13].mxu0 }
 0xfb4   :  { %v241_v20 = vadd.f32 %v1774_v9, %v1720_v25 }
 0xfb5   :  { %v1285_v21 = vmul.f32 -1.442695, %v861_v19 }
 0xfb7   :  { %1599 = vpow2.f32 %v1285_v21 }
 0xfb8   :  { %1601 = vtanh.f32 %v861_v19 }
 0xfc1   :  { %v1600_v22 = vpop.eup %1599 }
 0xfc2   :  { %v865_v26 = vadd.f32 1.0, %v1600_v22  ;;  %v1602_v10 = vpop.eup %1601 }
 0xfc4   :  { %1603 = vrcp.f32 %v865_v26 }
 0xfce   :  { %v1604_v27 = vpop.eup %1603 }
 0xfcf   :  { %v869_v0 = vsel %vm1723_vm6, %v1602_v10, %v1604_v27 }
 0xfd0   :  { %872 = vrot.lane.b32.xlu0 %v869_v0, %s1626_s12  ;;  %v870_v7 = vmul.f32 %v869_v0, %v774_v6 }
0x1042   :  { %v873_v11 = vpop.permute.xlu0 %872 }
0x1043   :  { %v875_v16 = vmul.f32 %v873_v11, %v869_v0 }
0x1045   :  { %877 = vrot.lane.b32.xlu1 %v875_v16, %s1627_s13 }
0x10b7   :  { %v878_v28 = vpop.permute.xlu1 %877 }
0x10b8   :  { %v1838_v29 = vadd.f32 %v878_v28, %v870_v7 }
0x10ba   :  { %1605 = vtanh.f32 %v1838_v29 }
0x10c4   :  { %v1606_v32 = vpop.eup %1605 }
0x10c5   :  { %883 = vrot.lane.b32.xlu0 %v1606_v32, %s1626_s12 }
0x1137   :  { %v884_v33 = vpop.permute.xlu0 %883 }
0x1138   :  { %v886_v34 = vmul.f32 %v884_v33, %v869_v0 }
0x113a   :  { %888 = vrot.lane.b32.xlu1 %v886_v34, %s1627_s13 }
0x11ac   :  { %v889_v39 = vpop.permute.xlu1 %888 }
0x11ad   :  { %892 = vst.msk [vmem:[#allocation3 + $0x28] sm:$0xff] %vm258_vm3, %v889_v39  ;;  %1459 = vmatmul.mubr.msk.f32.vlgmr.msra.gmra.mrb[8].mxu1 %vm258_vm3, %v889_v39 }
0x11ae   :  { %1547 = vmatpush3.bf16.msra.mxu1 %v1544_v31  ;;  %1480 = vmatprep.mubr.msk.f32.mxu1 %vm258_vm3, %v1110_v40 }
0x11af   :  { %1549 = vmatprep.subr.bf16.mxu1 %v1548_v38 }
0x11b2   :  { %1551 = vmatpush3.bf16.msra.mxu1 %v1548_v38 }
0x11b4   :  { %v1115_v45 = vld [vmem:[#allocation3 + $0x28] sm:$0xff] }
0x11b5   :  { %1481 = vmatmul.mubr.msk.f32.vlgmr.msra.gmra.mrb[10].mxu1 %vm258_vm3, %v1111_v41 }
0x11b6   :  { %1483 = vmatprep.mubr.msk.f32.mxu1 %vm258_vm3, %v1112_v42 }
0x11b9   :  { %1484 = vmatmul.mubr.msk.f32.gmra.mrb[12].mxu1 %vm258_vm3, %v1113_v43 }
0x11ba   :  { %1486 = vmatprep.mubr.msk.f32.mxu1 %vm258_vm3, %v1114_v44 }
0x11bd   :  { %1487 = vmatmul.mubr.msk.f32.gmra.mrb[14].mxu1 %vm258_vm3, %v1115_v45 }
0x1280   :  { %v963_v47 = vpop.f32.mrb[8].mxu1 }
0x1281   :  { %v967_v48 = vadd.f32 %v963_v47, %v236_v46  ;;  %v1460_v23 = vpop.f32.mrb[9].mxu1 }
0x1283   :  { %v1287_v49 = vmul.f32 -1.442695, %v967_v48 }
0x1285   :  { %1607 = vpow2.f32 %v1287_v49 }
0x1286   :  { %1609 = vtanh.f32 %v967_v48 }
0x1288   :  { %v1482_v51 = vpop.f32.mrb[10].mxu1 }
0x1289   :  { %v1218_v52 = vadd.f32 %v1482_v51, %v1868_v50  ;;  %v1212_v53 = vpop.f32.mrb[11].mxu1 }
0x128a   :  { %v1213_v54 = vadd.f32 %v1868_v50, %v1212_v53 }
0x128b   :  { %1252 = vst [vmem:[%s1925_s3 + $0x8] sm:$0xff] %v1218_v52 }
0x128c   :  { %1251 = vst [vmem:[%s1925_s3] sm:$0xff] %v1213_v54  ;;  %v1485_v12 = vpop.f32.mrb[12].mxu1 }
0x128d   :  { %v1228_v55 = vadd.f32 %v1485_v12, %v1868_v50  ;;  %v1222_v56 = vpop.f32.mrb[13].mxu1 }
0x128e   :  { %v1223_v57 = vadd.f32 %v1868_v50, %v1222_v56 }
0x128f   :  { %v1608_v58 = vpop.eup %1607  ;;  %1254 = vst [vmem:[%s1925_s3 + $0x18] sm:$0xff] %v1228_v55 }
0x1290   :  { %v971_v59 = vadd.f32 1.0, %v1608_v58  ;;  %1253 = vst [vmem:[%s1925_s3 + $0x10] sm:$0xff] %v1223_v57  ;;  %v1488_v60 = vpop.f32.mrb[14].mxu1  ;;  %v1610_v1 = vpop.eup %1609 }
0x1291   :  { %v1238_v61 = vadd.f32 %v1488_v60, %v1868_v50  ;;  %v1232_v62 = vpop.f32.mrb[15].mxu1 }
0x1292   :  { %1611 = vrcp.f32 %v971_v59  ;;  %v1233_v63 = vadd.f32 %v1868_v50, %v1232_v62 }
0x1293   :  { %1256 = vst [vmem:[%s1925_s3 + $0x28] sm:$0xff] %v1238_v61 }
0x1294   :  { %1255 = vst [vmem:[%s1925_s3 + $0x20] sm:$0xff] %v1233_v63 }
0x129c   :  { %v1612_v2 = vpop.eup %1611 }
0x129d   :  { %v975_v3 = vsel %vm1723_vm6, %v1610_v1, %v1612_v2 }
0x129e   :  { %978 = vrot.lane.b32.xlu0 %v975_v3, %s1626_s12  ;;  %v976_v6 = vmul.f32 %v975_v3, %v1838_v29 }
0x1310   :  { %v979_v4 = vpop.permute.xlu0 %978 }
0x1311   :  { %v981_v5 = vmul.f32 %v979_v4, %v975_v3 }
0x1313   :  { %983 = vrot.lane.b32.xlu1 %v981_v5, %s1627_s13 }
0x1385   :  { %v984_v8 = vpop.permute.xlu1 %983 }
0x1386   :  { %v986_v13 = vadd.f32 %v984_v8, %v976_v6 }
0x1388   :  { %1613 = vtanh.f32 %v986_v13 }
0x1392   :  { %v1614_v14 = vpop.eup %1613 }
0x1393   :  { %989 = vrot.lane.b32.xlu0 %v1614_v14, %s1626_s12 }
0x1405   :  { %v990_v15 = vpop.permute.xlu0 %989 }
0x1406   :  { %v992_v17 = vmul.f32 %v990_v15, %v975_v3 }
0x1408   :  { %994 = vrot.lane.b32.xlu1 %v992_v17, %s1627_s13 }
0x147a   :  { %v995_v18 = vpop.permute.xlu1 %994 }
0x147b   :  { %998 = vst.msk [vmem:[#allocation3 + $0x30] sm:$0xff] %vm258_vm3, %v995_v18  ;;  %1470 = vmatmul.mubr.msk.f32.vlgmr.msra.gmra.mrb[14].mxu0 %vm258_vm3, %v995_v18 }
0x1482   :  { %v1116_v19 = vld [vmem:[#allocation3 + $0x30] sm:$0xff] }
0x1483   :  { %1489 = vmatprep.mubr.msk.f32.mxu1 %vm258_vm3, %v1116_v19 }
0x154e   :  { %v1069_v21 = vpop.f32.mrb[14].mxu0 }
0x154f   :  { %v1073_v22 = vadd.f32 %v1069_v21, %v241_v20  ;;  %v1471_v26 = vpop.f32.mrb[15].mxu0 }
0x1551   :  { %v1289_v10 = vmul.f32 -1.442695, %v1073_v22 }
0x1553   :  { %1615 = vpow2.f32 %v1289_v10 }
0x1554   :  { %1617 = vtanh.f32 %v1073_v22 }
0x155d   :  { %v1616_v27 = vpop.eup %1615 }
0x155e   :  { %v1077_v0 = vadd.f32 1.0, %v1616_v27  ;;  %v1618_v11 = vpop.eup %1617 }
0x1560   :  { %1619 = vrcp.f32 %v1077_v0 }
0x156a   :  { %v1620_v16 = vpop.eup %1619 }
0x156b   :  { %v1081_v7 = vsel %vm1723_vm6, %v1618_v11, %v1620_v16 }
0x156c   :  { %1084 = vrot.lane.b32.xlu0 %v1081_v7, %s1626_s12  ;;  %v1082_v25 = vmul.f32 %v1081_v7, %v986_v13 }
0x15de   :  { %v1085_v28 = vpop.permute.xlu0 %1084 }
0x15df   :  { %v1087_v29 = vmul.f32 %v1085_v28, %v1081_v7 }
0x15e1   :  { %1089 = vrot.lane.b32.xlu1 %v1087_v29, %s1627_s13 }
0x1653   :  { %v1090_v9 = vpop.permute.xlu1 %1089 }
0x1654   :  { %v1092_v24 = vadd.f32 %v1090_v9, %v1082_v25 }
0x1656   :  { %1621 = vtanh.f32 %v1092_v24 }
0x1660   :  { %v1622_v30 = vpop.eup %1621 }
0x1661   :  { %1095 = vrot.lane.b32.xlu0 %v1622_v30, %s1626_s12 }
0x16d3   :  { %v1096_v31 = vpop.permute.xlu0 %1095 }
0x16d4   :  { %v1098_v32 = vmul.f32 %v1096_v31, %v1081_v7 }
0x16d6   :  { %1100 = vrot.lane.b32.xlu1 %v1098_v32, %s1627_s13 }
0x1748   :  { %v1101_v33 = vpop.permute.xlu1 %1100 }
0x1749   :  { %1104 = vst.msk [vmem:[#allocation3 + $0x38] sm:$0xff] %vm258_vm3, %v1101_v33 }
0x1750   :  { %v1117_v35 = vld [vmem:[#allocation3 + $0x38] sm:$0xff] }
0x1751   :  { %1490 = vmatmul.mubr.msk.f32.gmra.mrb[16].mxu1 %vm258_vm3, %v1117_v35 }
0x1824   :  { %v1491_v34 = vpop.f32.mrb[16].mxu1 }
0x1825   :  { %v1248_v36 = vadd.f32 %v1491_v34, %v1868_v50  ;;  %v1242_v37 = vpop.f32.mrb[17].mxu1 }
0x1826   :  { %v1243_v38 = vadd.f32 %v1868_v50, %v1242_v37 }
0x1827   :  { %1258 = vst [vmem:[%s1925_s3 + $0x38] sm:$0xff] %v1248_v36 }
0x1828   :  { %1257 = vst [vmem:[%s1925_s3 + $0x30] sm:$0xff] %v1243_v38 }

</bundles_post_ra>
